<compile_context>
chip_gen: v7x
topology: tpu7x:2x2x1
jax: 0.10.0
libtpu: 0.0.40
codegen_flags: <defaults>
</compile_context>

<pallas_src>
import functools
import math

import jax
import jax.numpy as jnp
from jax.experimental import pallas as pl
from jax.experimental.pallas import tpu as pltpu


# ---------------------------------------------------------------------------
# PositionalEncoding buffer (identical to the PyTorch __init__).
# ---------------------------------------------------------------------------
def make_positional_encoding_table(max_len: int, d_model: int) -> jnp.ndarray:
    position = jnp.arange(max_len, dtype=jnp.float32)[:, None]
    div_term = jnp.exp(
        jnp.arange(0, d_model, 2, dtype=jnp.float32) * (-math.log(10000.0) / d_model)
    )
    pe = jnp.zeros((max_len, d_model), dtype=jnp.float32)
    pe = pe.at[:, 0::2].set(jnp.sin(position * div_term))
    pe = pe.at[:, 1::2].set(jnp.cos(position * div_term))
    return pe[:, None, :]  # [max_len, 1, d_model] — same layout as the torch buffer


# ---------------------------------------------------------------------------
# Pallas kernels
# ---------------------------------------------------------------------------
def _add_pe_kernel(x_ref, pe_ref, o_ref, *, nb, ts, resident):
    # x_ref/o_ref: (ts, nb, D); pe_ref: (S_pad, D) if resident else (ts, D).
    if resident:
        pe = pe_ref[pl.ds(pl.program_id(0) * ts, ts), :]
    else:
        pe = pe_ref[...]
    # Broadcast over the middle axis as a static per-column loop of dense 2-D
    # adds (sublane-strided views into the padded block) — no in-kernel reshape.
    for b in range(nb):
        y = x_ref[:, b, :].astype(jnp.float32) + pe
        o_ref[:, b, :] = y.astype(o_ref.dtype)


def _add_pe_dropout_kernel(x_ref, pe_ref, keep_ref, o_ref, *, nb, ts, resident, scale):
    # keep_ref holds a {0, 1} float32 mask generated in the wrapper.
    if resident:
        pe = pe_ref[pl.ds(pl.program_id(0) * ts, ts), :]
    else:
        pe = pe_ref[...]
    s = jnp.float32(scale)
    for b in range(nb):
        y = x_ref[:, b, :].astype(jnp.float32) + pe
        o_ref[:, b, :] = (y * (keep_ref[:, b, :] * s)).astype(o_ref.dtype)


# ---------------------------------------------------------------------------
# Tiling / budgeting helpers (padding-aware)
# ---------------------------------------------------------------------------
def _round_up(n, m):
    return (n + m - 1) // m * m


def _vmem_limit_bytes():
    """Per-TensorCore scoped-VMEM budget.

    v5e/v6e have 128 MiB physical VMEM, so deep tiles with a raised limit pay off
    (amortize the ~0.35us per-grid-step overhead).  v7x has 64 MiB physical /
    32 MiB scoped per TC; unknown backends (e.g. the CPU interpreter) get the
    same conservative cap."""
    kind = ""
    try:
        kind = jax.devices()[0].device_kind.lower()
    except Exception:
        pass
    if "v5" in kind or "v6" in kind:
        return 96 * (1 << 20)
    return 32 * (1 << 20)


def _padded_row_bytes(n_mid, d):
    # One leading-axis row of a (ts, n_mid, d) f32 block as laid out in VMEM:
    # the trailing two dims are padded to the native (8, 128) vreg tile.
    return _round_up(max(int(n_mid), 1), 8) * _round_up(max(int(d), 1), 128) * 4


def _choose_row_tile(s, n_mid, d, *, n_stream_bufs, vmem_limit):
    """Largest leading-axis tile whose double-buffered streaming working set
    (x / out / optional mask buffers) fits the VMEM budget, padding-aware."""
    row = _padded_row_bytes(n_mid, d)
    budget = max(vmem_limit - (6 << 20), row)  # headroom: resident pe + scratch
    rows = int(max(1, min(budget // (row * n_stream_bufs), s)))
    if rows < s and rows % 8 != 0:
        # keep tiled pe blocks (second-minor = rows) 8-row aligned
        rows = min(s, max(8, rows - rows % 8))
    return rows


# ---------------------------------------------------------------------------
# PositionalEncoding.forward
# ---------------------------------------------------------------------------
def positional_encoding_forward(x, pe, *, dropout_p=0.1, training=False, rng=None,
                                row_block=None, pe_resident=None):
    """x: [A0, A1, D]; returns x + pe[:A0] (broadcast over axis 1), then inverted
    dropout when training.  Same semantics as PyTorch PositionalEncoding.forward
    (the module indexes pe by axis 0 of whatever tensor it is given)."""
    S, B, D = x.shape
    pe2 = pe.reshape(pe.shape[0], pe.shape[-1])[:S].astype(jnp.float32)  # [S, D]
    p = float(dropout_p)
    use_dropout = bool(training) and p > 0.0
    scale = 1.0 / (1.0 - p) if use_dropout else 1.0
    if use_dropout and rng is None:
        rng = jax.random.PRNGKey(0)

    # Lane-sparse d_model (D % 128 != 0): a standalone Pallas kernel would emit
    # masked partial stores on mostly-padding vregs; let XLA fuse the add into
    # its neighbours instead.
    if D % 128 != 0:
        y = x.astype(jnp.float32) + pe2[:, None, :]
        if use_dropout:
            keep = jax.random.bernoulli(rng, 1.0 - p, x.shape)
            y = jnp.where(keep, y * scale, 0.0)
        return y.astype(x.dtype)

    vmem_limit = _vmem_limit_bytes()
    n_stream_bufs = 6 if use_dropout else 4  # double-buffered x, out (+ f32 mask)
    if row_block is None:
        ts = _choose_row_tile(S, B, D, n_stream_bufs=n_stream_bufs,
                              vmem_limit=vmem_limit)
    else:
        ts = max(1, min(int(row_block), S))
        if ts < S and ts % 8 != 0:
            ts = min(S, max(8, ts - ts % 8))
    n_tiles = pl.cdiv(S, ts)
    s_pad = n_tiles * ts

    # pe is S*D per pass regardless of B; when the padded table is small keep it
    # resident in VMEM (one DMA total) and slice it per grid step in-kernel.
    pe_pad_bytes = _round_up(s_pad, 8) * _round_up(D, 128) * 4
    resident = (pe_pad_bytes <= (2 << 20)) if pe_resident is None else bool(pe_resident)

    if resident:
        pe_in = pe2 if s_pad == S else jnp.pad(pe2, ((0, s_pad - S), (0, 0)))
        pe_spec = pl.BlockSpec((s_pad, D), lambda i: (0, 0))
    else:
        pe_in = pe2
        pe_spec = pl.BlockSpec((ts, D), lambda i: (i, 0))

    x_spec = pl.BlockSpec((ts, B, D), lambda i: (i, 0, 0))
    out_spec = pl.BlockSpec((ts, B, D), lambda i: (i, 0, 0))
    out_shape = jax.ShapeDtypeStruct((S, B, D), x.dtype)
    cparams = pltpu.CompilerParams(
        dimension_semantics=("parallel",),  # v7x: the 2 TCs split the row grid
        vmem_limit_bytes=vmem_limit,
    )

    if not use_dropout:
        kern = functools.partial(_add_pe_kernel, nb=B, ts=ts, resident=resident)
        return pl.pallas_call(
            kern,
            out_shape=out_shape,
            grid_spec=pltpu.PrefetchScalarGridSpec(
                num_scalar_prefetch=0,
                grid=(n_tiles,),
                in_specs=[x_spec, pe_spec],
                out_specs=out_spec,
            ),
            input_output_aliases={0: 0},  # x -> out, in place when x is donatable
            compiler_params=cparams,
        )(x, pe_in)

    # Training path: fused add + mask + scale.  Mask is generated with
    # jax.random (portable); see TODO(synk) at the top about the hardware PRNG.
    keep = jax.random.bernoulli(rng, 1.0 - p, (S, B, D)).astype(jnp.float32)
    keep_spec = pl.BlockSpec((ts, B, D), lambda i: (i, 0, 0))
    kern = functools.partial(_add_pe_dropout_kernel, nb=B, ts=ts,
                             resident=resident, scale=scale)
    return pl.pallas_call(
        kern,
        out_shape=out_shape,
        grid_spec=pltpu.PrefetchScalarGridSpec(
            num_scalar_prefetch=0,
            grid=(n_tiles,),
            in_specs=[x_spec, pe_spec, keep_spec],
            out_specs=out_spec,
        ),
        input_output_aliases={0: 0},  # operand 0 is x (no scalar-prefetch args)
        compiler_params=cparams,
    )(x, pe_in, keep)


# ---------------------------------------------------------------------------
# TransformerCognateModel — the rest of the forward pass (plain JAX / XLA glue).
# ---------------------------------------------------------------------------
def _init_linear(key, fan_in, fan_out):
    kw, kb = jax.random.split(key)
    lim = 1.0 / math.sqrt(fan_in)
    w = jax.random.uniform(kw, (fan_in, fan_out), jnp.float32, -lim, lim)
    b = jax.random.uniform(kb, (fan_out,), jnp.float32, -lim, lim)
    return w, b


def init_model_params(key, vocab_size, d_model, hidden_dim):
    ks = jax.random.split(key, 9)
    wq, bq = _init_linear(ks[1], d_model, d_model)
    wk, bk = _init_linear(ks[2], d_model, d_model)
    wv, bv = _init_linear(ks[3], d_model, d_model)
    wo, bo = _init_linear(ks[4], d_model, d_model)
    w1, b1 = _init_linear(ks[5], d_model, hidden_dim)
    w2, b2 = _init_linear(ks[6], hidden_dim, d_model)
    fc1_w, fc1_b = _init_linear(ks[7], 2 * d_model, 64)
    fc2_w, fc2_b = _init_linear(ks[8], 64, 1)
    return {
        "embedding": 0.1 * jax.random.normal(ks[0], (vocab_size, d_model), jnp.float32),
        "layer0": {
            "attn": {"wq": wq, "bq": bq, "wk": wk, "bk": bk,
                     "wv": wv, "bv": bv, "wo": wo, "bo": bo},
            "ln1_g": jnp.ones((d_model,), jnp.float32),
            "ln1_b": jnp.zeros((d_model,), jnp.float32),
            "w1": w1, "b1": b1, "w2": w2, "b2": b2,
            "ln2_g": jnp.ones((d_model,), jnp.float32),
            "ln2_b": jnp.zeros((d_model,), jnp.float32),
        },
        "fc1_w": fc1_w, "fc1_b": fc1_b, "fc2_w": fc2_w, "fc2_b": fc2_b,
    }


def _layer_norm(x, g, b, eps=1e-5):
    mu = x.mean(axis=-1, keepdims=True)
    var = ((x - mu) ** 2).mean(axis=-1, keepdims=True)
    return (x - mu) * jax.lax.rsqrt(var + eps) * g + b


def _multi_head_attention(x, p, key_padding_mask, nhead):
    B, S, D = x.shape
    dh = D // nhead
    q = x @ p["wq"] + p["bq"]
    k = x @ p["wk"] + p["bk"]
    v = x @ p["wv"] + p["bv"]
    split = lambda t: t.reshape(B, S, nhead, dh).transpose(0, 2, 1, 3)
    q, k, v = split(q), split(k), split(v)
    scores = jnp.einsum("bhqd,bhkd->bhqk", q, k) / math.sqrt(dh)
    if key_padding_mask is not None:  # True == padded key position
        scores = scores + jnp.where(key_padding_mask[:, None, None, :], -1e30, 0.0)
    attn = jax.nn.softmax(scores, axis=-1)
    ctx = jnp.einsum("bhqk,bhkd->bhqd", attn, v)
    ctx = ctx.transpose(0, 2, 1, 3).reshape(B, S, D)
    return ctx @ p["wo"] + p["bo"]


def _encoder_layer(x, p, key_padding_mask, nhead):
    # Post-norm TransformerEncoderLayer, dropout=0.0, activation=relu.
    a = _multi_head_attention(x, p["attn"], key_padding_mask, nhead)
    x = _layer_norm(x + a, p["ln1_g"], p["ln1_b"])
    f = jax.nn.relu(x @ p["w1"] + p["b1"]) @ p["w2"] + p["b2"]
    return _layer_norm(x + f, p["ln2_g"], p["ln2_b"])


def encode_word(tokens, mask, params, pe, *, nhead=2, positional_dropout=0.2,
                training=False, rng=None):
    x = params["embedding"][tokens]  # [B, S, D] (batch_first)
    # Faithful to the PyTorch module: PositionalEncoding indexes pe by axis 0 of
    # whatever tensor it receives — here the BATCH axis — and broadcasts over
    # axis 1 (the sequence), exactly like the torch code does with this model.
    x = positional_encoding_forward(x, pe, dropout_p=positional_dropout,
                                    training=training, rng=rng)
    x = _encoder_layer(x, params["layer0"], mask, nhead)
    return x.mean(axis=1)  # [B, D]


def transformer_cognate_forward(word_pair, word_pair_masks, params, pe, *,
                                nhead=2, positional_dropout=0.2, training=False,
                                rng=None):
    if training and rng is None:
        rng = jax.random.PRNGKey(0)
    r1 = r2 = None
    if training:
        r1, r2 = jax.random.split(rng)
    enc1 = encode_word(word_pair[:, 0, :], word_pair_masks[:, 0, :], params, pe,
                       nhead=nhead, positional_dropout=positional_dropout,
                       training=training, rng=r1)
    enc2 = encode_word(word_pair[:, 1, :], word_pair_masks[:, 1, :], params, pe,
                       nhead=nhead, positional_dropout=positional_dropout,
                       training=training, rng=r2)
    # TODO(synk): the PyTorch forward flips [enc1, enc2] order with
    # random.choice; fixed order here for determinism.
    combined = jnp.concatenate([enc1, enc2], axis=1)
    h = jax.nn.relu(combined @ params["fc1_w"] + params["fc1_b"])
    return jax.nn.sigmoid(h @ params["fc2_w"] + params["fc2_b"])


# ---------------------------------------------------------------------------
# Demo / correctness checks
# ---------------------------------------------------------------------------
if __name__ == "__main__":
    SEQ, BATCH, MAX_LEN = 8, 2, 64
    D_MODEL, VOCAB, HIDDEN = 128, 50, 64  # lane-dense d_model -> Pallas path

    root = jax.random.PRNGKey(0)
    k_x, k_x2, k_xs, k_tok, k_par, k_drop = jax.random.split(root, 6)

    pe = make_positional_encoding_table(MAX_LEN, D_MODEL)

    # 1) Pallas path, eval mode, [seq, batch, d_model] layout.
    x = jax.random.normal(k_x, (SEQ, BATCH, D_MODEL), dtype=jnp.float32)
    out = jax.block_until_ready(
        positional_encoding_forward(x, pe, dropout_p=0.2, training=False))
    ref = x + pe[:SEQ]
    assert out.shape == x.shape and out.dtype == x.dtype
    assert jnp.allclose(out, ref, atol=1e-6, rtol=1e-6)

    # 2) Multi-tile grid, partial trailing tile, resident AND streamed pe paths.
    S2 = 100
    pe_big = make_positional_encoding_table(128, D_MODEL)
    x2 = jax.random.normal(k_x2, (S2, BATCH, D_MODEL), dtype=jnp.float32)
    ref2 = x2 + pe_big[:S2]
    out2a = jax.block_until_ready(
        positional_encoding_forward(x2, pe_big, training=False, row_block=32))
    out2b = jax.block_until_ready(
        positional_encoding_forward(x2, pe_big, training=False, row_block=32,
                                    pe_resident=False))
    assert jnp.allclose(out2a, ref2, atol=1e-6, rtol=1e-6)
    assert jnp.allclose(out2b, ref2, atol=1e-6, rtol=1e-6)

    # 3) Training-mode dropout (fused add + mask + scale in the kernel).
    P_DROP = 0.2
    drop = jax.block_until_ready(
        positional_encoding_forward(x2, pe_big, dropout_p=P_DROP, training=True,
                                    rng=k_drop, row_block=32))
    kept = drop != 0.0
    keep_frac = float(jnp.mean(kept.astype(jnp.float32)))
    assert 0.70 < keep_frac < 0.90, keep_frac
    ref_scaled = ref2 * (1.0 / (1.0 - P_DROP))
    assert jnp.allclose(jnp.where(kept, drop, 0.0),
                        jnp.where(kept, ref_scaled, 0.0), atol=1e-5, rtol=1e-5)

    # 4) Lane-sparse d_model (32) falls back to the fused XLA path, same math.
    d_small = 32
    pe_small = make_positional_encoding_table(MAX_LEN, d_small)
    xs = jax.random.normal(k_xs, (SEQ, BATCH, d_small), dtype=jnp.float32)
    outs = jax.block_until_ready(
        positional_encoding_forward(xs, pe_small, training=False))
    assert jnp.allclose(outs, xs + pe_small[:SEQ], atol=1e-6, rtol=1e-6)

    # 5) Full TransformerCognateModel forward (eval); d_model=128 puts the Pallas
    #    positional-encoding kernel on the model's hot path.
    params = init_model_params(k_par, VOCAB, D_MODEL, HIDDEN)
    word_pair = jax.random.randint(k_tok, (BATCH, 2, SEQ), 0, VOCAB)
    word_pair_masks = (jnp.zeros((BATCH, 2, SEQ), dtype=bool)
                       .at[:, :, SEQ - 2:].set(True))  # last 2 positions padded
    probs = jax.block_until_ready(
        transformer_cognate_forward(word_pair, word_pair_masks, params, pe))
    assert probs.shape == (BATCH, 1)
    assert bool(jnp.all((probs >= 0.0) & (probs <= 1.0)))

    # TODO(synk): training-mode dropout will not match torch's RNG stream
    # bit-for-bit (different PRNG); inverted-dropout semantics match.
    print("KERNEL_OK")
</pallas_src>

<mosaic_0001>
module attributes {stable_mosaic.version = 11 : i64} {
  func.func @_add_pe_kernel(%arg0: i32, %arg1: memref<8x2x128xf32, #tpu.memory_space<vmem>>, %arg2: memref<8x128xf32, #tpu.memory_space<vmem>>, %arg3: memref<8x2x128xf32, #tpu.memory_space<vmem>>) attributes {dimension_semantics = [#tpu.dimension_semantics<parallel>], iteration_bounds = array<i64: 1>, scalar_prefetch = 0 : i64, scratch_operands = 0 : i64, tpu.core_type = #tpu.core_type<tc>, window_params = [{transform_indices = @transform_0, window_bounds = array<i64: 8, 2, 128>}, {pipeline_mode = #tpu.pipeline_mode<synchronous>, transform_indices = @transform_1, window_bounds = array<i64: 8, 128>}, {transform_indices = @transform_2, window_bounds = array<i64: 8, 2, 128>}]} {
    %c8_i32 = arith.constant 8 : i32
    %0 = arith.muli %arg0, %c8_i32 : i32
    %1 = arith.index_cast %0 : i32 to index
    %c0 = arith.constant 0 : index
    %2 = vector.load %arg2[%1, %c0] : memref<8x128xf32, #tpu.memory_space<vmem>>, vector<8x128xf32>
    %c0_0 = arith.constant 0 : index
    %c0_1 = arith.constant 0 : index
    %c0_2 = arith.constant 0 : index
    %3 = vector.load %arg1[%c0_0, %c0_1, %c0_2] : memref<8x2x128xf32, #tpu.memory_space<vmem>>, vector<8x1x128xf32>
    %4 = vector.shape_cast %3 : vector<8x1x128xf32> to vector<8x128xf32>
    %5 = arith.addf %4, %2 : vector<8x128xf32>
    %c0_3 = arith.constant 0 : index
    %c0_4 = arith.constant 0 : index
    %c0_5 = arith.constant 0 : index
    %6 = vector.load %arg3[%c0_3, %c0_4, %c0_5] : memref<8x2x128xf32, #tpu.memory_space<vmem>>, vector<8x1x128xf32>
    %7 = vector.shape_cast %6 : vector<8x1x128xf32> to vector<8x128xf32>
    %8 = vector.shape_cast %5 : vector<8x128xf32> to vector<8x1x128xf32>
    tpu.vector_store %arg3[%c0_3, %c0_4, %c0_5], %8 {strides = array<i32>} : memref<8x2x128xf32, #tpu.memory_space<vmem>>, vector<8x1x128xf32>,
    %c0_6 = arith.constant 0 : index
    %c1 = arith.constant 1 : index
    %c0_7 = arith.constant 0 : index
    %9 = vector.load %arg1[%c0_6, %c1, %c0_7] : memref<8x2x128xf32, #tpu.memory_space<vmem>>, vector<8x1x128xf32>
    %10 = vector.shape_cast %9 : vector<8x1x128xf32> to vector<8x128xf32>
    %11 = arith.addf %10, %2 : vector<8x128xf32>
    %c0_8 = arith.constant 0 : index
    %c1_9 = arith.constant 1 : index
    %c0_10 = arith.constant 0 : index
    %12 = vector.load %arg3[%c0_8, %c1_9, %c0_10] : memref<8x2x128xf32, #tpu.memory_space<vmem>>, vector<8x1x128xf32>
    %13 = vector.shape_cast %12 : vector<8x1x128xf32> to vector<8x128xf32>
    %14 = vector.shape_cast %11 : vector<8x128xf32> to vector<8x1x128xf32>
    tpu.vector_store %arg3[%c0_8, %c1_9, %c0_10], %14 {strides = array<i32>} : memref<8x2x128xf32, #tpu.memory_space<vmem>>, vector<8x1x128xf32>,
    return
  }
  func.func @transform_0(%arg0: i32) -> (i32, i32, i32) {
    %c0_i32 = arith.constant 0 : i32
    %c0_i32_0 = arith.constant 0 : i32
    %c0_i32_1 = arith.constant 0 : i32
    return %arg0, %c0_i32, %c0_i32_0 : i32, i32, i32
  }
  func.func @transform_1(%arg0: i32) -> (i32, i32) {
    %c0_i32 = arith.constant 0 : i32
    %c0_i32_0 = arith.constant 0 : i32
    %c0_i32_1 = arith.constant 0 : i32
    return %c0_i32, %c0_i32_0 : i32, i32
  }
  func.func @transform_2(%arg0: i32) -> (i32, i32, i32) {
    %c0_i32 = arith.constant 0 : i32
    %c0_i32_0 = arith.constant 0 : i32
    %c0_i32_1 = arith.constant 0 : i32
    return %arg0, %c0_i32, %c0_i32_0 : i32, i32, i32
  }
}

</mosaic_0001>

<bundles_post_ra>
// kernel: tpu_custom_call.1
= control target key start
LH: loop header
LB: loop body
LE: loop exit
PB: predicated region body
PF: predicated region fallthrough
CT: control target
= control target key end

     0   :  { %7 = vsyncpa [#allocation3], 0  ;;  %s214_s0 = inlined_call_operand.hbm [shape: f32[8,2,128], index: 0, kind: input, shape index: {}, may-alias: {0,2}]   ;;  %s215_s1 = inlined_call_operand.vmem [shape: f32[8,128], index: 1, kind: input, shape index: {}]   ;;  %s216_s2 = inlined_call_operand.hbm [shape: f32[8,2,128], index: 2, kind: output, shape index: {}, may-alias: {0,2}]  }
   0x1   :  { %8 = vsyncpa [#allocation4], 0  ;;  %s162_s9 = smov [#allocation2]   ;;  %s114_s13 = scalar_lea.hbm %s214_s0, 256 }
   0x2   :  { %s14_s10 = sshll.u32 %s162_s9, 4  ;;  %p115_p0 = scmp.ne.s32.totalorder %s214_s0, %s114_s13  ;;  %s15_s10 = int_to_ptr.vmem [resolvable:$true] %s14_s10 }
   0x3   :  { %p118_p1 = scmp.lt.u32.totalorder %s114_s13, %s214_s0 }
   0x5   :  { %p120_p2 = pnand %p118_p1, %p115_p0 }
   0x7   :  { %123 = shalt.err (!%p120_p2)
}
   0x8   :  { %s124_s18 = scalar_lea.vmem %s15_s10, 256  ;;  %p129_p4 = scmp.lt.s32.totalorder %s15_s10, %s15_s10 }
   0x9   :  { %p125_p3 = scmp.ne.s32.totalorder %s15_s10, %s124_s18  ;;  %p130_p5 = scmp.lt.s32.totalorder %s124_s18, %s124_s18 }
   0xb   :  { %p131_p6 = por %p130_p5, %p129_p4 }
   0xd   :  { %p132_p7 = pnand %p131_p6, %p125_p3 }
   0xf   :  { %135 = shalt.err (!%p132_p7)
}
  0x10   :  { %s163_s19 = smov 32   ;;  %s164_s20 = smov 2  }
  0x11   :  { %20 = dma.hbm_to_vmem [thread:$0]  %s214_s0, 256, %s15_s10, [#allocation3], %s163_s19, %s163_s19, %s164_s20  }
  0x12   :  { %158 = dma.done.wait [#allocation3], 256  }
  0x13   :  { %159 = vsyncadd [#allocation3], 4294967040  ;;  %v28_v0 = vld [vmem:[%s215_s1] sm:$0xff]  ;;  %v33_v9 = vld [vmem:[#allocation2 + $0x8] sm:$0x1]  ;;  %s165_s0 = smov [#allocation5]  }
  0x14   :  { %v29_v1 = vld [vmem:[#allocation2] sm:$0x1]  ;;  %v30_v2 = vld [vmem:[#allocation2 + $0x2] sm:$0x1]  ;;  %v38_v4 = vrot.slane %v28_v0, 1  ;;  %v39_v6 = vrot.slane %v28_v0, 2 }
  0x15   :  { %v53_v3 = vadd.f32 %v29_v1, %v28_v0  ;;  %v31_v5 = vld [vmem:[#allocation2 + $0x4] sm:$0x1]  ;;  %v32_v7 = vld [vmem:[#allocation2 + $0x6] sm:$0x1]  ;;  %v40_v8 = vrot.slane %v28_v0, 3  ;;  %v41_v10 = vrot.slane %v28_v0, 4 }
  0x16   :  { %v34_v11 = vld [vmem:[#allocation2 + $0xa] sm:$0x1]  ;;  %v54_v12 = vadd.f32 %v38_v4, %v30_v2  ;;  %v55_v13 = vadd.f32 %v39_v6, %v31_v5  ;;  %v42_v14 = vrot.slane %v28_v0, 5  ;;  %v35_v15 = vld [vmem:[#allocation2 + $0xc] sm:$0x1]  ;;  %v43_v16 = vrot.slane %v28_v0, 6 }
  0x17   :  { %61 = vst [vmem:[#allocation5] sm:$0x1] %v53_v3  ;;  %v36_v17 = vld [vmem:[#allocation2 + $0xe] sm:$0x1]  ;;  %v56_v18 = vadd.f32 %v40_v8, %v32_v7  ;;  %v57_v19 = vadd.f32 %v41_v10, %v33_v9  ;;  %v44_v20 = vrot.slane %v28_v0, 7  ;;  %s98_s1 = sshll.u32 %s165_s0, 4  ;;  %s99_s1 = int_to_ptr.vmem [resolvable:$true] %s98_s1 }
  0x18   :  { %v69_v21 = vld [vmem:[#allocation2 + $0x1] sm:$0x1]  ;;  %v70_v22 = vld [vmem:[#allocation2 + $0x3] sm:$0x1]  ;;  %62 = vst [vmem:[#allocation5 + $0x2] sm:$0x1] %v54_v12  ;;  %v58_v23 = vadd.f32 %v42_v14, %v34_v11  ;;  %v59_v24 = vadd.f32 %v43_v16, %v35_v15  ;;  %p141_p9 = scmp.lt.s32.totalorder %s99_s1, %s99_s1 }
  0x19   :  { %63 = vst [vmem:[#allocation5 + $0x4] sm:$0x1] %v55_v13  ;;  %v77_v25 = vadd.f32 %v69_v21, %v28_v0  ;;  %v78_v26 = vadd.f32 %v70_v22, %v38_v4  ;;  %v71_v27 = vld [vmem:[#allocation2 + $0x5] sm:$0x1]  ;;  %v72_v28 = vld [vmem:[#allocation2 + $0x7] sm:$0x1]  ;;  %v60_v30 = vadd.f32 %v44_v20, %v36_v17 }
  0x1a   :  { %v73_v29 = vld [vmem:[#allocation2 + $0x9] sm:$0x1]  ;;  %64 = vst [vmem:[#allocation5 + $0x6] sm:$0x1] %v56_v18  ;;  %65 = vst [vmem:[#allocation5 + $0x8] sm:$0x1] %v57_v19  ;;  %v79_v31 = vadd.f32 %v71_v27, %v39_v6  ;;  %v80_v32 = vadd.f32 %v72_v28, %v40_v8 }
  0x1b   :  { %v81_v33 = vadd.f32 %v73_v29, %v41_v10  ;;  %v74_v34 = vld [vmem:[#allocation2 + $0xb] sm:$0x1]  ;;  %v75_v35 = vld [vmem:[#allocation2 + $0xd] sm:$0x1]  ;;  %v76_v36 = vld [vmem:[#allocation2 + $0xf] sm:$0x1] }
  0x1c   :  { %66 = vst [vmem:[#allocation5 + $0xa] sm:$0x1] %v58_v23  ;;  %67 = vst [vmem:[#allocation5 + $0xc] sm:$0x1] %v59_v24  ;;  %v82_v37 = vadd.f32 %v74_v34, %v42_v14  ;;  %v83_v38 = vadd.f32 %v75_v35, %v43_v16  ;;  %v84_v39 = vadd.f32 %v76_v36, %v44_v20  ;;  %s136_s25 = scalar_lea.vmem %s99_s1, 256 }
  0x1d   :  { %85 = vst [vmem:[#allocation5 + $0x1] sm:$0x1] %v77_v25  ;;  %86 = vst [vmem:[#allocation5 + $0x3] sm:$0x1] %v78_v26  ;;  %p137_p8 = scmp.ne.s32.totalorder %s99_s1, %s136_s25  ;;  %p142_p10 = scmp.lt.s32.totalorder %s136_s25, %s136_s25 }
  0x1e   :  { %68 = vst [vmem:[#allocation5 + $0xe] sm:$0x1] %v60_v30  ;;  %87 = vst [vmem:[#allocation5 + $0x5] sm:$0x1] %v79_v31 }
  0x1f   :  { %88 = vst [vmem:[#allocation5 + $0x7] sm:$0x1] %v80_v32  ;;  %89 = vst [vmem:[#allocation5 + $0x9] sm:$0x1] %v81_v33  ;;  %p143_p11 = por %p142_p10, %p141_p9 }
  0x20   :  { %90 = vst [vmem:[#allocation5 + $0xb] sm:$0x1] %v82_v37  ;;  %91 = vst [vmem:[#allocation5 + $0xd] sm:$0x1] %v83_v38 }
  0x21   :  { %92 = vst [vmem:[#allocation5 + $0xf] sm:$0x1] %v84_v39  ;;  %p144_p12 = pnand %p143_p11, %p137_p8 }
  0x23   :  { %147 = shalt.err (!%p144_p12)
}
  0x24   :  { %s148_s28 = scalar_lea.hbm %s216_s2, 256 }
  0x25   :  { %p149_p13 = scmp.ne.s32.totalorder %s216_s2, %s148_s28  ;;  %p152_p0 = scmp.lt.u32.totalorder %s148_s28, %s216_s2 }
  0x27   :  { %p154_p1 = pnand %p152_p0, %p149_p13 }
  0x29   :  { %157 = shalt.err (!%p154_p1)
}
  0x2a   :  { %104 = dma.vmem_to_hbm [thread:$0]  %s99_s1, 256, %s216_s2, [#allocation4], %s163_s19, %s163_s19, %s164_s20  }
  0x2b   :  { %160 = dma.done.wait [#allocation4], 256  }
  0x2c   :  { %161 = vsyncadd [#allocation4], 4294967040 }
  0x2d   :  { %108 = vsyncpa [#allocation3], 1 }
  0x2e   :  { %109 = vsyncpa [#allocation4], 1 }

</bundles_post_ra>
